<compile_context>
chip_gen: v6e
topology: v6e:2x2x1
jax: 0.10.0
libtpu: 0.0.40
codegen_flags: <defaults>
</compile_context>

<pallas_src>
import jax
import jax.numpy as jnp
from jax.experimental import pallas as pl
from jax.experimental.pallas import tpu as pltpu

LN_EPS = 1e-5  # PyTorch nn.LayerNorm default
VMEM_LIMIT_BYTES = 32 * 1024 * 1024


def _concat_posenc_kernel(x_ref, timing_ref, gamma_ref, beta_ref, o_ref):
    # x_ref:      (tT, H)   current batch element / sequence tile
    # timing_ref: (tT, H)   shared timing tile (resident across the inner batch axis)
    # gamma_ref:  (2, H)    LayerNorm weight: row 0 = x half, row 1 = timing half
    # beta_ref:   (2, H)    LayerNorm bias:   same layout
    # o_ref:      (tT, D)   output tile, D = 2 * H
    x = x_ref[...].astype(jnp.float32)                 # (tT, H)
    t = timing_ref[...].astype(jnp.float32)            # (tT, H)
    H = x.shape[-1]
    inv_d = 1.0 / (2 * H)

    x_sum = jnp.sum(x, axis=-1, keepdims=True)          # (tT, 1) XLU reduction
    t_sum = jnp.sum(t, axis=-1, keepdims=True)          # (tT, 1)
    mu = (x_sum + t_sum) * inv_d                         # (tT, 1)

    xc = x - mu
    tc = t - mu
    ssq_x = jnp.sum(xc * xc, axis=-1, keepdims=True)     # direct centered sums:
    ssq_t = jnp.sum(tc * tc, axis=-1, keepdims=True)     # numerically safe, free filler
    var = (ssq_x + ssq_t) * inv_d                        # biased variance (PyTorch LN)
    inv = jax.lax.rsqrt(var + LN_EPS)                    # EUP rsqrt

    gamma_lo = gamma_ref[0:1, :].astype(jnp.float32)     # (1, H)
    gamma_hi = gamma_ref[1:2, :].astype(jnp.float32)
    beta_lo = beta_ref[0:1, :].astype(jnp.float32)
    beta_hi = beta_ref[1:2, :].astype(jnp.float32)

    # Write the two halves directly; each store is lane-dense when H % 128 == 0.
    o_ref[:, :H] = ((xc * inv) * gamma_lo + beta_lo).astype(o_ref.dtype)
    o_ref[:, H:] = ((tc * inv) * gamma_hi + beta_hi).astype(o_ref.dtype)


def _round_up(x, m):
    return ((x + m - 1) // m) * m


def _choose_seq_tile(T, H, itemsize, target_rows=512,
                     vmem_budget_bytes=16 * 1024 * 1024):
    """Pick a sequence tile: >= target_rows when T permits, within the VMEM budget.

    Per grid step the pipelined working set is x (H) + timing (H) + out (2H) per row,
    each double-buffered -> 8 * H * itemsize bytes per row (gamma/beta are negligible).
    The caller zero-pads T up to a multiple of the returned tile.
    """
    bytes_per_row = 8 * H * itemsize
    cap_rows = max(8, (vmem_budget_bytes // bytes_per_row) // 8 * 8)
    tile = min(_round_up(max(T, 1), 8), max(target_rows, 8), cap_rows)
    tile = max(8, (tile // 8) * 8)
    return tile


def concat_positional_encoding(x, timing_table, ln_weight, ln_bias, *, seq_tile=None):
    """x: (B, T, H); timing_table: (max_len, H); ln_weight/ln_bias: (D,) with D = 2*H."""
    B, T, H = x.shape
    D = 2 * H
    assert ln_weight.shape == (D,) and ln_bias.shape == (D,)
    assert timing_table.shape[0] >= T and timing_table.shape[1] == H
    # NOTE: output half-stores are lane-dense (unmasked vst) when H % 128 == 0; other H
    # values still work but fall back to masked stores.

    itemsize = jnp.dtype(x.dtype).itemsize
    if seq_tile is None:
        seq_tile = _choose_seq_tile(T, H, itemsize)
    seq_tile = max(8, (seq_tile // 8) * 8)

    # Pad the sequence axis (never fall back to tiny tiles for awkward T). Padded rows
    # are all-zero -> var = 0 -> rsqrt(eps) is finite; they are sliced off below.
    T_pad = _round_up(T, seq_tile)
    n_t = T_pad // seq_tile

    # TODO(synk): T must be known at trace time; truly dynamic lengths would need
    # BoundedSlice / scalar-prefetched lengths.
    timing = timing_table[:T, :]                         # static slice of the parameter
    if T_pad != T:
        x = jnp.pad(x, ((0, 0), (0, T_pad - T), (0, 0)))
        timing = jnp.pad(timing, ((0, T_pad - T), (0, 0)))

    gamma2 = ln_weight.reshape(2, H)                     # row 0 = x half, row 1 = timing half
    beta2 = ln_bias.reshape(2, H)

    cost = pl.CostEstimate(
        flops=10 * B * T_pad * D,                        # rough: elementwise + row reductions
        transcendentals=B * T_pad,                       # one rsqrt per row
        bytes_accessed=itemsize * (B * T_pad * H + T_pad * H + B * T_pad * D) + 8 * D,
    )

    out = pl.pallas_call(
        _concat_posenc_kernel,
        out_shape=jax.ShapeDtypeStruct((B, T_pad, D), x.dtype),
        grid_spec=pltpu.PrefetchScalarGridSpec(
            num_scalar_prefetch=0,
            # Batch innermost: timing/gamma/beta block indices are constant across the
            # inner axis -> they stay resident in VMEM instead of being re-fetched.
            grid=(n_t, B),
            in_specs=[
                # Leading batch dim squeezed (None) -> kernel sees (tT, H) / (tT, D).
                pl.BlockSpec((None, seq_tile, H), lambda t, b: (b, t, 0)),  # x tile
                pl.BlockSpec((seq_tile, H), lambda t, b: (t, 0)),           # timing (shared)
                pl.BlockSpec((2, H), lambda t, b: (0, 0)),                  # gamma halves
                pl.BlockSpec((2, H), lambda t, b: (0, 0)),                  # beta halves
            ],
            out_specs=pl.BlockSpec((None, seq_tile, D), lambda t, b: (b, t, 0)),
        ),
        compiler_params=pltpu.CompilerParams(
            # Outer sequence axis shards across TCs; inner batch axis is sequential so
            # the shared inputs stay resident.
            dimension_semantics=("parallel", "arbitrary"),
            vmem_limit_bytes=VMEM_LIMIT_BYTES,
        ),
        cost_estimate=cost,
    )(x, timing, gamma2, beta2)

    if T_pad != T:
        out = out[:, :T, :]
    return out


def _reference(x, timing_table, ln_weight, ln_bias):
    B, T, H = x.shape
    timing = jnp.broadcast_to(timing_table[None, :T, :], (B, T, H))
    cat = jnp.concatenate([x.astype(jnp.float32), timing.astype(jnp.float32)], axis=-1)
    mu = jnp.mean(cat, axis=-1, keepdims=True)
    var = jnp.mean((cat - mu) ** 2, axis=-1, keepdims=True)
    return (cat - mu) / jnp.sqrt(var + LN_EPS) * ln_weight + ln_bias


if __name__ == "__main__":
    # Small shapes consistent with the module defaults: d_model=256 -> H=128.
    B, D_MODEL, MAX_LEN = 2, 256, 128
    H = D_MODEL // 2

    key = jax.random.PRNGKey(0)
    kx, kt, kw, kb, kx2 = jax.random.split(key, 5)
    # nn.init.normal_ on timing_table; non-trivial affine params to exercise the
    # half-split LayerNorm weight/bias path.
    timing_table = jax.random.normal(kt, (MAX_LEN, H), dtype=jnp.float32)
    ln_weight = 1.0 + 0.1 * jax.random.normal(kw, (D_MODEL,), dtype=jnp.float32)
    ln_bias = 0.1 * jax.random.normal(kb, (D_MODEL,), dtype=jnp.float32)

    # Case 1: T that tiles exactly (grid = (1, B)).
    T1 = 64
    x1 = jax.random.normal(kx, (B, T1, H), dtype=jnp.float32)
    out1 = concat_positional_encoding(x1, timing_table, ln_weight, ln_bias)
    out1 = jax.block_until_ready(out1)
    ref1 = _reference(x1, timing_table, ln_weight, ln_bias)
    assert out1.shape == (B, T1, D_MODEL), out1.shape
    err1 = float(jnp.max(jnp.abs(out1 - ref1)))
    assert jnp.allclose(out1, ref1, atol=1e-5, rtol=1e-5), err1

    # Case 2: awkward T (exercises the zero-padding path, padded rows sliced off).
    T2 = 50
    x2 = jax.random.normal(kx2, (B, T2, H), dtype=jnp.float32)
    out2 = concat_positional_encoding(x2, timing_table, ln_weight, ln_bias)
    out2 = jax.block_until_ready(out2)
    ref2 = _reference(x2, timing_table, ln_weight, ln_bias)
    assert out2.shape == (B, T2, D_MODEL), out2.shape
    err2 = float(jnp.max(jnp.abs(out2 - ref2)))
    assert jnp.allclose(out2, ref2, atol=1e-5, rtol=1e-5), err2

    print("KERNEL_OK")
</pallas_src>

<mosaic_0001>
module attributes {stable_mosaic.version = 11 : i64} {
  func.func @_concat_posenc_kernel(%arg0: i32, %arg1: i32, %arg2: memref<1x64x128xf32, #tpu.memory_space<vmem>>, %arg3: memref<64x128xf32, #tpu.memory_space<vmem>>, %arg4: memref<2x128xf32, #tpu.memory_space<vmem>>, %arg5: memref<2x128xf32, #tpu.memory_space<vmem>>, %arg6: memref<1x64x256xf32, #tpu.memory_space<vmem>>) attributes {dimension_semantics = [#tpu.dimension_semantics<parallel>, #tpu.dimension_semantics<arbitrary>], iteration_bounds = array<i64: 1, 2>, scalar_prefetch = 0 : i64, scratch_operands = 0 : i64, tpu.core_type = #tpu.core_type<tc>, window_params = [{transform_indices = @transform_0, window_bounds = array<i64: 1, 64, 128>}, {transform_indices = @transform_1, window_bounds = array<i64: 64, 128>}, {pipeline_mode = #tpu.pipeline_mode<synchronous>, transform_indices = @transform_2, window_bounds = array<i64: 2, 128>}, {pipeline_mode = #tpu.pipeline_mode<synchronous>, transform_indices = @transform_3, window_bounds = array<i64: 2, 128>}, {transform_indices = @transform_4, window_bounds = array<i64: 1, 64, 256>}]} {
    %c0 = arith.constant 0 : index
    %c0_0 = arith.constant 0 : index
    %c0_1 = arith.constant 0 : index
    %0 = vector.load %arg2[%c0, %c0_0, %c0_1] : memref<1x64x128xf32, #tpu.memory_space<vmem>>, vector<1x64x128xf32>
    %1 = vector.shape_cast %0 : vector<1x64x128xf32> to vector<64x128xf32>
    %c0_2 = arith.constant 0 : index
    %c0_3 = arith.constant 0 : index
    %2 = vector.load %arg3[%c0_2, %c0_3] : memref<64x128xf32, #tpu.memory_space<vmem>>, vector<64x128xf32>
    %cst = arith.constant dense<0.000000e+00> : vector<64xf32>
    %3 = vector.multi_reduction <add>, %1, %cst [1] : vector<64x128xf32> to vector<64xf32>
    %4 = vector.shape_cast %3 : vector<64xf32> to vector<64x1xf32>
    %cst_4 = arith.constant dense<0.000000e+00> : vector<64xf32>
    %5 = vector.multi_reduction <add>, %2, %cst_4 [1] : vector<64x128xf32> to vector<64xf32>
    %6 = vector.shape_cast %5 : vector<64xf32> to vector<64x1xf32>
    %7 = arith.addf %4, %6 : vector<64x1xf32>
    %cst_5 = arith.constant 3.906250e-03 : f32
    %8 = vector.broadcast %cst_5 : f32 to vector<64x1xf32>
    %9 = arith.mulf %7, %8 : vector<64x1xf32>
    %10 = vector.broadcast %9 : vector<64x1xf32> to vector<64x128xf32>
    %11 = arith.subf %1, %10 : vector<64x128xf32>
    %12 = vector.broadcast %9 : vector<64x1xf32> to vector<64x128xf32>
    %13 = arith.subf %2, %12 : vector<64x128xf32>
    %14 = arith.mulf %11, %11 : vector<64x128xf32>
    %cst_6 = arith.constant dense<0.000000e+00> : vector<64xf32>
    %15 = vector.multi_reduction <add>, %14, %cst_6 [1] : vector<64x128xf32> to vector<64xf32>
    %16 = vector.shape_cast %15 : vector<64xf32> to vector<64x1xf32>
    %17 = arith.mulf %13, %13 : vector<64x128xf32>
    %cst_7 = arith.constant dense<0.000000e+00> : vector<64xf32>
    %18 = vector.multi_reduction <add>, %17, %cst_7 [1] : vector<64x128xf32> to vector<64xf32>
    %19 = vector.shape_cast %18 : vector<64xf32> to vector<64x1xf32>
    %20 = arith.addf %16, %19 : vector<64x1xf32>
    %cst_8 = arith.constant 3.906250e-03 : f32
    %21 = vector.broadcast %cst_8 : f32 to vector<64x1xf32>
    %22 = arith.mulf %20, %21 : vector<64x1xf32>
    %cst_9 = arith.constant 9.99999974E-6 : f32
    %23 = vector.broadcast %cst_9 : f32 to vector<64x1xf32>
    %24 = arith.addf %22, %23 : vector<64x1xf32>
    %25 = math.rsqrt %24 : vector<64x1xf32>
    %c0_10 = arith.constant 0 : index
    %c0_11 = arith.constant 0 : index
    %26 = vector.load %arg4[%c0_10, %c0_11] : memref<2x128xf32, #tpu.memory_space<vmem>>, vector<1x128xf32>
    %c1 = arith.constant 1 : index
    %c0_12 = arith.constant 0 : index
    %27 = vector.load %arg4[%c1, %c0_12] : memref<2x128xf32, #tpu.memory_space<vmem>>, vector<1x128xf32>
    %c0_13 = arith.constant 0 : index
    %c0_14 = arith.constant 0 : index
    %28 = vector.load %arg5[%c0_13, %c0_14] : memref<2x128xf32, #tpu.memory_space<vmem>>, vector<1x128xf32>
    %c1_15 = arith.constant 1 : index
    %c0_16 = arith.constant 0 : index
    %29 = vector.load %arg5[%c1_15, %c0_16] : memref<2x128xf32, #tpu.memory_space<vmem>>, vector<1x128xf32>
    %30 = vector.broadcast %25 : vector<64x1xf32> to vector<64x128xf32>
    %31 = arith.mulf %11, %30 : vector<64x128xf32>
    %32 = vector.broadcast %26 : vector<1x128xf32> to vector<64x128xf32>
    %33 = arith.mulf %31, %32 : vector<64x128xf32>
    %34 = vector.broadcast %28 : vector<1x128xf32> to vector<64x128xf32>
    %35 = arith.addf %33, %34 : vector<64x128xf32>
    %c0_17 = arith.constant 0 : index
    %c0_18 = arith.constant 0 : index
    %c0_19 = arith.constant 0 : index
    %36 = vector.load %arg6[%c0_17, %c0_18, %c0_19] : memref<1x64x256xf32, #tpu.memory_space<vmem>>, vector<1x64x128xf32>
    %37 = vector.shape_cast %36 : vector<1x64x128xf32> to vector<64x128xf32>
    %38 = vector.shape_cast %35 : vector<64x128xf32> to vector<1x64x128xf32>
    tpu.vector_store %arg6[%c0_17, %c0_18, %c0_19], %38 {strides = array<i32>} : memref<1x64x256xf32, #tpu.memory_space<vmem>>, vector<1x64x128xf32>,
    %39 = vector.broadcast %25 : vector<64x1xf32> to vector<64x128xf32>
    %40 = arith.mulf %13, %39 : vector<64x128xf32>
    %41 = vector.broadcast %27 : vector<1x128xf32> to vector<64x128xf32>
    %42 = arith.mulf %40, %41 : vector<64x128xf32>
    %43 = vector.broadcast %29 : vector<1x128xf32> to vector<64x128xf32>
    %44 = arith.addf %42, %43 : vector<64x128xf32>
    %c0_20 = arith.constant 0 : index
    %c0_21 = arith.constant 0 : index
    %c128 = arith.constant 128 : index
    %45 = vector.load %arg6[%c0_20, %c0_21, %c128] : memref<1x64x256xf32, #tpu.memory_space<vmem>>, vector<1x64x128xf32>
    %46 = vector.shape_cast %45 : vector<1x64x128xf32> to vector<64x128xf32>
    %47 = vector.shape_cast %44 : vector<64x128xf32> to vector<1x64x128xf32>
    tpu.vector_store %arg6[%c0_20, %c0_21, %c128], %47 {strides = array<i32>} : memref<1x64x256xf32, #tpu.memory_space<vmem>>, vector<1x64x128xf32>,
    return
  }
  func.func @transform_0(%arg0: i32, %arg1: i32) -> (i32, i32, i32) {
    %c0_i32 = arith.constant 0 : i32
    %c0_i32_0 = arith.constant 0 : i32
    return %arg1, %arg0, %c0_i32 : i32, i32, i32
  }
  func.func @transform_1(%arg0: i32, %arg1: i32) -> (i32, i32) {
    %c0_i32 = arith.constant 0 : i32
    %c0_i32_0 = arith.constant 0 : i32
    return %arg0, %c0_i32 : i32, i32
  }
  func.func @transform_2(%arg0: i32, %arg1: i32) -> (i32, i32) {
    %c0_i32 = arith.constant 0 : i32
    %c0_i32_0 = arith.constant 0 : i32
    %c0_i32_1 = arith.constant 0 : i32
    return %c0_i32, %c0_i32_0 : i32, i32
  }
  func.func @transform_3(%arg0: i32, %arg1: i32) -> (i32, i32) {
    %c0_i32 = arith.constant 0 : i32
    %c0_i32_0 = arith.constant 0 : i32
    %c0_i32_1 = arith.constant 0 : i32
    return %c0_i32, %c0_i32_0 : i32, i32
  }
  func.func @transform_4(%arg0: i32, %arg1: i32) -> (i32, i32, i32) {
    %c0_i32 = arith.constant 0 : i32
    %c0_i32_0 = arith.constant 0 : i32
    return %arg1, %arg0, %c0_i32 : i32, i32, i32
  }
}

</mosaic_0001>

<bundles_post_ra>
// kernel: tpu_custom_call.1
= control target key start
LH: loop header
LB: loop body
LE: loop exit
PB: predicated region body
PF: predicated region fallthrough
CT: control target
= control target key end

     0   :  { %s1291_s0 = inlined_call_operand.hbm [shape: f32[2,64,128], index: 0, kind: input, shape index: {}]   ;;  %s1292_s1 = inlined_call_operand.hbm [shape: f32[64,128], index: 1, kind: input, shape index: {}]   ;;  %s1293_s2 = inlined_call_operand.vmem [shape: f32[2,128], index: 2, kind: input, shape index: {}]   ;;  %s1294_s3 = inlined_call_operand.vmem [shape: f32[2,128], index: 3, kind: input, shape index: {}]   ;;  %s1295_s4 = inlined_call_operand.hbm [shape: f32[2,64,256], index: 4, kind: output, shape index: {}]  }
   0x1   :  { %1299 = sst [smem:[#allocation11_spill]] %s1292_s1 }
   0x2   :  { %9 = vsyncpa [#allocation3], 0 }
   0x3   :  { %11 = vsyncpa [#allocation3 + $0x1], 0 }
   0x4   :  { %12 = vsyncpa [#allocation6], 0 }
   0x5   :  { %13 = vsyncpa [#allocation4], 0 }
   0x6   :  { %15 = vsyncpa [#allocation4 + $0x1], 0  ;;  %s908_s15 = smov 0   ;;  %s910_s16 = smov 0  }
   0x7   :  { %s912_s17 = smov 0   ;;  %s914_s18 = smov 0  }
   0x8   :  { %s916_s19 = smov 0   ;;  %s918_s20 = smov 0  }
   0x9 LB: > { %s620_s21 = sadd.s32 4294967295, %s874_s20   ;;  %s621_s22 = sadd.s32 4294967294, %s874_s20   ;;  %s874_s20 = sphi %s918_s20, %s21_s20   ;;  %s870_s19 = sphi %s916_s19, %s1319_s19   ;;  %s866_s18 = sphi %s914_s18, %s1318_s18   ;;  %s862_s17 = sphi %s912_s17, %s1317_s17   ;;  %s858_s16 = sphi %s910_s16, %s1316_s16   ;;  %s854_s15 = sphi %s908_s15, %s1315_s15  }
   0xa   : > { %p55_p0 = scmp.ne.s32.totalorder %s858_s16, %s854_s15  ;;  %p942_p1 = scmp.eq.s32.totalorder %s620_s21, 0 }
   0xb   : > { %p946_p2 = scmp.eq.s32.totalorder %s620_s21, 1  ;;  %p155_p3 = scmp.eq.s32.totalorder %s621_s22, 1 }
   0xc   : > { %p952_p4 = por %p942_p1, %p55_p0  ;;  %p622_p5 = scmp.ge.s32.totalorder %s874_s20, 1 }
   0xd   : > { %p957_p6 = por %p155_p3, %p55_p0  ;;  %p162_p7 = scmp.lt.s32.totalorder %s874_s20, 3 }
   0xe   : > { %s1302_s25 = scalar_select %p952_p4, 1, 0 }
   0xf   : > { %s1303_s26 = scalar_select %p957_p6, 1, 0 }
  0x10   : > { %p962_p8 = pnand %p622_p5, %p162_p7  ;;  %s876_s28 = smov [#allocation5]  }
  0x11   : > { %s177_s29 = sshll.u32 %s876_s28, 4  ;;  %s30_s5 = sadd.s32 1, %s870_s19  ;;  %s178_s29 = int_to_ptr.vmem [resolvable:$true] %s177_s29 }
  0x12   : > { %p651_p9 = pneg %p962_p8  ;;  %s747_s6 = scalar_lea.vmem %s178_s29, 1024 }
  0x13   : > { %p748_p13 = scmp.ne.s32.totalorder %s178_s29, %s747_s6  ;;  %p755_p5 = scmp.lt.s32.totalorder %s178_s29, %s178_s29 }
  0x14   : > { %p971_p11 = pnand %p651_p9, %p942_p1  ;;  %p756_p7 = scmp.lt.s32.totalorder %s747_s6, %s747_s6 }
  0x16   : > { %p738_p12 = pneg %p971_p11  ;;  %p757_p6 = por %p756_p7, %p755_p5 }
  0x18   : > { %p750_p0 = pnand %p748_p13, %p738_p12 }
  0x1a   : > { %p751_p3 = pneg %p750_p0 }
  0x1c   : > { %p758_p4 = pnand %p757_p6, %p751_p3 }
  0x1e   : > { %761 = shalt.err (!%p758_p4)
}
  0x1f   : > { %s1297_s7 = smov 128   ;;  %s1298_s8 = smov 8  }
  0x20   : > { %s1306_s1 = sld [smem:[#allocation11_spill]]  ;;  %p31_p4 = scmp.ge.s32.totalorder %s30_s5, 2 }
  0x21   : > { %s42_s11 = sadd.s32 1, %s862_s17  ;;  %p49_p6 = scmp.ne.s32.totalorder %s862_s17, %s858_s16 }
  0x22   : > { %p50_p9 = scmp.eq.s32.totalorder %s874_s20, 0  ;;  %s1321_s5 = smov (%p31_p4, %s30_s5), 0 }
  0x23   : > { %p998_p13 = por %p946_p2, %p49_p6  ;;  %s37_s14 = ssub.s32 %s870_s19, %s1321_s5 }
  0x24   : > { %p992_p12 = por %p50_p9, %p49_p6  ;;  %p664_p0 = scmp.lt.s32.totalorder %s874_s20, 2 }
  0x25   : > { %s197_s21 = sand.u32 1, %s862_s17  }
  0x26   : > { %654 = dma.hbm_to_vmem [thread:$0]  (!%p971_p11), %s1306_s1, 1024, %s178_s29, [#allocation6], %s1297_s7, %s1297_s7, %s1298_s8  }
  0x27   : > { %p40_p11 = scmp.eq.s32.totalorder %s37_s14, 0  ;;  %s625_s22 = sshll.u32 %s197_s21, 6 }
  0x28   : > { %s641_s29 = sshll.u32 %s870_s19, 10  ;;  %s201_s10 = scalar_lea.vmem [#allocation2], %s625_s22 }
  0x29   : > { %s1007_s28 = scalar_select %p40_p11, %s862_s17, %s42_s11  }
  0x2a   : > { %s209_s9 = scalar_lea.hbm %s1291_s0, %s641_s29  ;;  %s210_s7 = sshll.u32 %s201_s10, 4  ;;  %s211_s7 = int_to_ptr.vmem [resolvable:$true] %s210_s7 }
  0x2b   : > { %p1015_p2 = pnand %p664_p0, %p992_p12  ;;  %s198_s8 = scalar_lea.sflag [#allocation3], %s197_s21 }
  0x2c   : > { %s775_s14 = scalar_lea.vmem %s211_s7, 1024  ;;  %s879_s11 = smov [#allocation2]  }
  0x2d   : > { %p764_p3 = pneg %p1015_p2  ;;  %p776_p5 = scmp.ne.s32.totalorder %s211_s7, %s775_s14 }
  0x2e   : > { %s780_s1 = sshll.u32 %s879_s11, 4  ;;  %s781_s1 = int_to_ptr.vmem [resolvable:$false] %s780_s1 }
  0x2f   : > { %p778_p7 = pnand %p776_p5, %p764_p3  ;;  %s782_s29 = scalar_lea.vmem %s781_s1, 2048 }
  0x30   : > { %p783_p6 = scmp.lt.s32.totalorder %s211_s7, %s781_s1  ;;  %p784_p9 = scmp.lt.s32.totalorder %s782_s29, %s775_s14 }
  0x31   : > { %p779_p4 = pneg %p778_p7 }
  0x32   : > { %p785_p11 = por %p784_p9, %p783_p6 }
  0x34   : > { %p786_p10 = pnand %p785_p11, %p779_p4 }
  0x36   : > { %789 = shalt.err (!%p786_p10)
}
  0x37   : > { %s1310_s12 = smov 8   ;;  %s1311_s22 = smov 128  }
  0x38   : > { %658 = dma.hbm_to_vmem [thread:$0]  (!%p1015_p2), %s209_s9, 1024, %s211_s7, %s198_s8, %s1311_s22, %s1311_s22, %s1310_s12  }
  0x39   : > { %222 = sbr.rel (%p962_p8) target bundleno = 435 (0x1b3), region = 36  ;;  %s1029_s21 = sand.u32 (!%p962_p8), 1, %s858_s16  }
  0x3a   : > { %s629_s1 = sshll.u32 (!%p962_p8), %s1029_s21, 6  ;;  %s225_s30 = scalar_lea.sflag (!%p962_p8), [#allocation3], %s1029_s21 }
  0x3b   : > { %s228_s6 = scalar_lea.vmem (!%p962_p8), [#allocation2], %s629_s1  ;;  %p1312_p12 = scmp.ne.s32.totalorder (!%p962_p8), %s1302_s25, 0 }
  0x3e   : > { %841 = dma.done.wait (%p1312_p12), %s225_s30, 1024  }
  0x3f   : > { %843 = vsyncadd (%p1312_p12), %s225_s30, 4294966272 }
  0x40   : > { %845 = dma.done.wait (%p942_p1), [#allocation6], 1024  }
  0x41   : > { %847 = vsyncadd (%p942_p1), [#allocation6], 4294966272  ;;  %v1041_v0 = vld [vmem:[%s228_s6 + $0x10] sm:$0xff]  ;;  %v260_v1 = vld [vmem:[%s228_s6] sm:$0xff]  ;;  %s631_s8 = sshll.u32 %s1029_s21, 7  ;;  %s642_s29 = sshll.u32 %s866_s18, 11 }
  0x42   : > { %280 = vadd.xlane.f32.xlu1 %v1041_v0  ;;  %276 = vadd.xlane.f32.xlu0 %v260_v1  ;;  %v263_v2 = vld [vmem:[%s228_s6 + $0x18] sm:$0xff]  ;;  %v261_v3 = vld [vmem:[%s228_s6 + $0x8] sm:$0xff]  ;;  %v264_v5 = vld [vmem:[%s228_s6 + $0x20] sm:$0xff]  ;;  %s1186_s11 = scalar_lea.vmem [#allocation7], %s631_s8  ;;  %s1235_s1 = scalar_lea.hbm %s1295_s4, %s642_s29 }
  0x43   : > { %v265_v4 = vld [vmem:[%s228_s6 + $0x28] sm:$0xff]  ;;  %v1044_v6 = vld [vmem:[%s228_s6 + $0x38] sm:$0xff]  ;;  %v1046_v7 = vld [vmem:[%s228_s6 + $0x30] sm:$0xff]  ;;  %s521_s12 = sshll.u32 %s1186_s11, 4  ;;  %s505_s30 = scalar_lea.sflag [#allocation4], %s1029_s21  ;;  %s1237_s12 = int_to_ptr.vmem [resolvable:$true] %s521_s12 }
  0x44   : > { %v1050_v8 = vld [vmem:[#allocation5 + $0x8] sm:$0xff]  ;;  %v1052_v9 = vld [vmem:[#allocation5] sm:$0xff]  ;;  %v1056_v10 = vld [vmem:[#allocation5 + $0x18] sm:$0xff]  ;;  %s790_s6 = scalar_lea.vmem %s1237_s12, 2048  ;;  %s880_s23 = smov [#allocation7]  }
  0x45   : > { %v1058_v11 = vld [vmem:[#allocation5 + $0x10] sm:$0xff]  ;;  %v1062_v12 = vld [vmem:[#allocation5 + $0x28] sm:$0xff]  ;;  %v1064_v13 = vld [vmem:[#allocation5 + $0x20] sm:$0xff]  ;;  %p791_p1 = scmp.ne.s32.totalorder %s1237_s12, %s790_s6  ;;  %s794_s25 = sshll.u32 %s880_s23, 4  ;;  %s795_s25 = int_to_ptr.vmem [resolvable:$false] %s794_s25 }
  0x46   : > { %282 = vadd.xlane.f32.xlu1 %v263_v2  ;;  %278 = vadd.xlane.f32.xlu0 %v261_v3  ;;  %v1068_v14 = vld [vmem:[#allocation5 + $0x38] sm:$0xff]  ;;  %v1070_v15 = vld [vmem:[#allocation5 + $0x30] sm:$0xff]  ;;  %s796_s27 = scalar_lea.vmem %s795_s25, 4096  ;;  %p797_p0 = scmp.lt.s32.totalorder %s1237_s12, %s795_s25 }
  0x47   : > { %p792_p8 = pnand %p791_p1, %p998_p13  ;;  %p798_p2 = scmp.lt.s32.totalorder %s796_s27, %s790_s6 }
  0x49   : > { %p793_p10 = pneg %p792_p8  ;;  %p799_p3 = por %p798_p2, %p797_p0 }
  0x4a   : > { %286 = vadd.xlane.f32.xlu1 %v265_v4  ;;  %284 = vadd.xlane.f32.xlu0 %v264_v5 }
  0x4b   : > { %p800_p5 = pnand %p799_p3, %p793_p10 }
  0x4e   : > { %290 = vadd.xlane.f32.xlu1 %v1044_v6  ;;  %288 = vadd.xlane.f32.xlu0 %v1046_v7 }
  0x52   : > { %294 = vadd.xlane.f32.xlu1 %v1050_v8  ;;  %292 = vadd.xlane.f32.xlu0 %v1052_v9 }
  0x56   : > { %298 = vadd.xlane.f32.xlu1 %v1056_v10  ;;  %296 = vadd.xlane.f32.xlu0 %v1058_v11 }
  0x5a   : > { %302 = vadd.xlane.f32.xlu1 %v1062_v12  ;;  %300 = vadd.xlane.f32.xlu0 %v1064_v13 }
  0x5e   : > { %306 = vadd.xlane.f32.xlu1 %v1068_v14  ;;  %304 = vadd.xlane.f32.xlu0 %v1070_v15 }
  0xcb   : > { %v281_v16 = vpop.xlane.xlu1 %280  ;;  %v277_v17 = vpop.xlane.xlu0 %276 }
  0xcf   : > { %v283_v18 = vpop.xlane.xlu1 %282  ;;  %v279_v19 = vpop.xlane.xlu0 %278 }
  0xd3   : > { %v287_v20 = vpop.xlane.xlu1 %286  ;;  %v285_v21 = vpop.xlane.xlu0 %284 }
  0xd7   : > { %v291_v22 = vpop.xlane.xlu1 %290  ;;  %v289_v23 = vpop.xlane.xlu0 %288 }
  0xdb   : > { %v295_v24 = vpop.xlane.xlu1 %294  ;;  %v293_v25 = vpop.xlane.xlu0 %292 }
  0xdc   : > { %v309_v26 = vadd.f32 %v295_v24, %v279_v19  ;;  %v308_v27 = vadd.f32 %v293_v25, %v277_v17 }
  0xde   : > { %v317_v28 = vmul.f32 0.00390625, %v309_v26  ;;  %v316_v29 = vmul.f32 0.00390625, %v308_v27 }
  0xdf   : > { %v299_v30 = vpop.xlane.xlu1 %298  ;;  %v297_v31 = vpop.xlane.xlu0 %296 }
  0xe0   : > { %v1074_v32 = vsub.f32 %v261_v3, %v317_v28  ;;  %v1076_v33 = vsub.f32 %v260_v1, %v316_v29  ;;  %v311_v34 = vadd.f32 %v299_v30, %v283_v18  ;;  %v310_v35 = vadd.f32 %v297_v31, %v281_v16 }
  0xe1   : > { %v1106_v62 = vsub.f32 %v1050_v8, %v317_v28  ;;  %v1113_v1 = vsub.f32 %v1052_v9, %v316_v29 }
  0xe2   : > { %v341_v36 = vmul.f32 %v1074_v32, %v1074_v32  ;;  %v340_v37 = vmul.f32 %v1076_v33, %v1076_v33  ;;  %v319_v38 = vmul.f32 0.00390625, %v311_v34  ;;  %v318_v39 = vmul.f32 0.00390625, %v310_v35 }
  0xe3   : > { %v303_v40 = vpop.xlane.xlu1 %302  ;;  %v301_v41 = vpop.xlane.xlu0 %300  ;;  %v365_v3 = vmul.f32 %v1106_v62, %v1106_v62 }
  0xe4   : > { %v313_v42 = vadd.f32 %v303_v40, %v287_v20  ;;  %v312_v43 = vadd.f32 %v301_v41, %v285_v21  ;;  %350 = vadd.xlane.f32.xlu1 %v341_v36  ;;  %348 = vadd.xlane.f32.xlu0 %v340_v37  ;;  %v1082_v44 = vsub.f32 %v263_v2, %v319_v38 }
  0xe5   : > { %v1085_v45 = vsub.f32 %v1041_v0, %v318_v39  ;;  %v1116_v2 = vsub.f32 %v1056_v10, %v319_v38 }
  0xe6   : > { %v321_v46 = vmul.f32 0.00390625, %v313_v42  ;;  %v320_v47 = vmul.f32 0.00390625, %v312_v43  ;;  %v343_v50 = vmul.f32 %v1082_v44, %v1082_v44 }
  0xe7   : > { %v307_v48 = vpop.xlane.xlu1 %306  ;;  %v305_v49 = vpop.xlane.xlu0 %304  ;;  %v342_v51 = vmul.f32 %v1085_v45, %v1085_v45 }
  0xe8   : > { %v1091_v52 = vsub.f32 %v265_v4, %v321_v46  ;;  %v1093_v53 = vsub.f32 %v264_v5, %v320_v47  ;;  %v315_v54 = vadd.f32 %v307_v48, %v291_v22  ;;  %v314_v55 = vadd.f32 %v305_v49, %v289_v23  ;;  %354 = vadd.xlane.f32.xlu1 %v343_v50 }
  0xe9   : > { %352 = vadd.xlane.f32.xlu0 %v342_v51  ;;  %v1121_v4 = vsub.f32 %v1058_v11, %v318_v39  ;;  %v364_v5 = vmul.f32 %v1113_v1, %v1113_v1  ;;  %v1131_v8 = vsub.f32 %v1064_v13, %v320_v47 }
  0xea   : > { %v345_v56 = vmul.f32 %v1091_v52, %v1091_v52  ;;  %v344_v57 = vmul.f32 %v1093_v53, %v1093_v53  ;;  %v323_v58 = vmul.f32 0.00390625, %v315_v54  ;;  %v322_v59 = vmul.f32 0.00390625, %v314_v55 }
  0xeb   : > { %v366_v9 = vmul.f32 %v1121_v4, %v1121_v4  ;;  %v368_v16 = vmul.f32 %v1131_v8, %v1131_v8 }
  0xec   : > { %v1100_v60 = vsub.f32 %v1044_v6, %v323_v58  ;;  %v1103_v61 = vsub.f32 %v1046_v7, %v322_v59  ;;  %358 = vadd.xlane.f32.xlu1 %v345_v56  ;;  %v1126_v6 = vsub.f32 %v1062_v12, %v321_v46  ;;  %v367_v7 = vmul.f32 %v1116_v2, %v1116_v2 }
  0xed   : > { %356 = vadd.xlane.f32.xlu0 %v344_v57  ;;  %v1136_v10 = vsub.f32 %v1068_v14, %v323_v58  ;;  %v1141_v12 = vsub.f32 %v1070_v15, %v322_v59 }
  0xee   : > { %v347_v63 = vmul.f32 %v1100_v60, %v1100_v60  ;;  %v346_v0 = vmul.f32 %v1103_v61, %v1103_v61  ;;  %v369_v11 = vmul.f32 %v1126_v6, %v1126_v6 }
  0xef   : > { %v371_v13 = vmul.f32 %v1136_v10, %v1136_v10  ;;  %v370_v17 = vmul.f32 %v1141_v12, %v1141_v12 }
  0xf0   : > { %362 = vadd.xlane.f32.xlu1 %v347_v63 }
  0xf1   : > { %360 = vadd.xlane.f32.xlu0 %v346_v0 }
  0xf4   : > { %374 = vadd.xlane.f32.xlu1 %v365_v3 }
  0xf5   : > { %372 = vadd.xlane.f32.xlu0 %v364_v5  ;;  %v1152_v5 = vld [vmem:[%s1293_s2] ss:$0 sm:$0xff] }
  0xf8   : > { %378 = vadd.xlane.f32.xlu1 %v367_v7  ;;  %v1157_v7 = vld [vmem:[%s1293_s2 + $0x1] ss:$0 sm:$0xff] }
  0xf9   : > { %376 = vadd.xlane.f32.xlu0 %v366_v9 }
  0xfc   : > { %382 = vadd.xlane.f32.xlu1 %v369_v11 }
  0xfd   : > { %380 = vadd.xlane.f32.xlu0 %v368_v16 }
 0x100   : > { %386 = vadd.xlane.f32.xlu1 %v371_v13  ;;  %v1165_v13 = vld [vmem:[%s1294_s3] ss:$0 sm:$0xff] }
 0x101   : > { %384 = vadd.xlane.f32.xlu0 %v370_v17  ;;  %v1170_v17 = vld [vmem:[%s1294_s3 + $0x1] ss:$0 sm:$0xff] }
 0x16d   : > { %v351_v14 = vpop.xlane.xlu1 %350  ;;  %v349_v18 = vpop.xlane.xlu0 %348 }
 0x171   : > { %v355_v19 = vpop.xlane.xlu1 %354 }
 0x172   : > { %v353_v20 = vpop.xlane.xlu0 %352 }
 0x175   : > { %v359_v21 = vpop.xlane.xlu1 %358 }
 0x176   : > { %v357_v15 = vpop.xlane.xlu0 %356 }
 0x179   : > { %v363_v22 = vpop.xlane.xlu1 %362 }
 0x17a   : > { %v361_v23 = vpop.xlane.xlu0 %360 }
 0x17d   : > { %v375_v24 = vpop.xlane.xlu1 %374 }
 0x17e   : > { %v389_v25 = vadd.f32 %v375_v24, %v351_v14  ;;  %v373_v26 = vpop.xlane.xlu0 %372 }
 0x17f   : > { %v388_v27 = vadd.f32 %v373_v26, %v349_v18 }
 0x180   : > { %v397_v28 = vmul.f32 0.00390625, %v389_v25 }
 0x181   : > { %v396_v29 = vmul.f32 0.00390625, %v388_v27  ;;  %v379_v30 = vpop.xlane.xlu1 %378 }
 0x182   : > { %v405_v31 = vadd.f32 1e-05, %v397_v28  ;;  %v391_v34 = vadd.f32 %v379_v30, %v355_v19  ;;  %v377_v35 = vpop.xlane.xlu0 %376 }
 0x183   : > { %v404_v36 = vadd.f32 1e-05, %v396_v29  ;;  %v390_v37 = vadd.f32 %v377_v35, %v353_v20 }
 0x184   : > { %720 = vrsqrt.f32 %v405_v31  ;;  %v399_v38 = vmul.f32 0.00390625, %v391_v34 }
 0x185   : > { %722 = vrsqrt.f32 %v404_v36  ;;  %v398_v39 = vmul.f32 0.00390625, %v390_v37  ;;  %v383_v40 = vpop.xlane.xlu1 %382 }
 0x186   : > { %v407_v41 = vadd.f32 1e-05, %v399_v38  ;;  %v393_v42 = vadd.f32 %v383_v40, %v359_v21  ;;  %v381_v43 = vpop.xlane.xlu0 %380 }
 0x187   : > { %v406_v46 = vadd.f32 1e-05, %v398_v39  ;;  %v392_v47 = vadd.f32 %v381_v43, %v357_v15 }
 0x188   : > { %724 = vrsqrt.f32 %v407_v41  ;;  %v401_v48 = vmul.f32 0.00390625, %v393_v42 }
 0x189   : > { %726 = vrsqrt.f32 %v406_v46  ;;  %v400_v49 = vmul.f32 0.00390625, %v392_v47  ;;  %v387_v50 = vpop.xlane.xlu1 %386 }
 0x18a   : > { %v409_v51 = vadd.f32 1e-05, %v401_v48  ;;  %v395_v54 = vadd.f32 %v387_v50, %v363_v22  ;;  %v385_v55 = vpop.xlane.xlu0 %384 }
 0x18b   : > { %v408_v56 = vadd.f32 1e-05, %v400_v49  ;;  %v394_v57 = vadd.f32 %v385_v55, %v361_v23 }
 0x18c   : > { %728 = vrsqrt.f32 %v409_v51  ;;  %v403_v58 = vmul.f32 0.00390625, %v395_v54 }
 0x18d   : > { %730 = vrsqrt.f32 %v408_v56  ;;  %v402_v59 = vmul.f32 0.00390625, %v394_v57 }
 0x18e   : > { %v411_v63 = vadd.f32 1e-05, %v403_v58 }
 0x18f   : > { %v410_v0 = vadd.f32 1e-05, %v402_v59 }
 0x190   : > { %732 = vrsqrt.f32 %v411_v63 }
 0x191   : > { %v721_v3 = vpop.eup %720  ;;  %734 = vrsqrt.f32 %v410_v0 }
 0x192   : > { %v723_v9 = vpop.eup %722  ;;  %v425_v11 = vmul.f32 %v721_v3, %v1074_v32  ;;  %v465_v16 = vmul.f32 %v721_v3, %v1106_v62 }
 0x193   : > { %v424_v14 = vmul.f32 %v723_v9, %v1076_v33  ;;  %v464_v18 = vmul.f32 %v723_v9, %v1113_v1 }
 0x194   : > { %v437_v19 = vmul.f32 %v1152_v5, %v425_v11  ;;  %v477_v32 = vmul.f32 %v1157_v7, %v465_v16 }
 0x195   : > { %v725_v20 = vpop.eup %724  ;;  %v436_v62 = vmul.f32 %v1152_v5, %v424_v14  ;;  %v476_v21 = vmul.f32 %v1157_v7, %v464_v18 }
 0x196   : > { %v727_v15 = vpop.eup %726  ;;  %v449_v22 = vadd.f32 %v1165_v13, %v437_v19  ;;  %v489_v23 = vadd.f32 %v1170_v17, %v477_v32  ;;  %v427_v24 = vmul.f32 %v725_v20, %v1082_v44  ;;  %v467_v33 = vmul.f32 %v725_v20, %v1116_v2 }
 0x197   : > { %v448_v1 = vadd.f32 %v1165_v13, %v436_v62  ;;  %v488_v25 = vadd.f32 %v1170_v17, %v476_v21  ;;  %v426_v26 = vmul.f32 %v727_v15, %v1085_v45  ;;  %v466_v27 = vmul.f32 %v727_v15, %v1121_v4 }
 0x198   : > { %457 = vst [vmem:[%s1186_s11 + $0x10] sm:$0xff] %v449_v22  ;;  %497 = vst [vmem:[%s1186_s11 + $0x18] sm:$0xff] %v489_v23  ;;  %v439_v44 = vmul.f32 %v1152_v5, %v427_v24  ;;  %v479_v2 = vmul.f32 %v1157_v7, %v467_v33 }
 0x199   : > { %v729_v28 = vpop.eup %728  ;;  %456 = vst [vmem:[%s1186_s11] sm:$0xff] %v448_v1  ;;  %496 = vst [vmem:[%s1186_s11 + $0x8] sm:$0xff] %v488_v25  ;;  %v438_v45 = vmul.f32 %v1152_v5, %v426_v26  ;;  %v478_v4 = vmul.f32 %v1157_v7, %v466_v27 }
 0x19a   : > { %v731_v29 = vpop.eup %730  ;;  %v451_v30 = vadd.f32 %v1165_v13, %v439_v44  ;;  %v491_v31 = vadd.f32 %v1170_v17, %v479_v2  ;;  %v429_v34 = vmul.f32 %v729_v28, %v1091_v52  ;;  %v469_v35 = vmul.f32 %v729_v28, %v1126_v6 }
 0x19b   : > { %v450_v36 = vadd.f32 %v1165_v13, %v438_v45  ;;  %v490_v37 = vadd.f32 %v1170_v17, %v478_v4  ;;  %v428_v38 = vmul.f32 %v731_v29, %v1093_v53  ;;  %v468_v39 = vmul.f32 %v731_v29, %v1131_v8 }
 0x19c   : > { %459 = vst [vmem:[%s1186_s11 + $0x30] sm:$0xff] %v451_v30  ;;  %499 = vst [vmem:[%s1186_s11 + $0x38] sm:$0xff] %v491_v31  ;;  %v441_v40 = vmul.f32 %v1152_v5, %v429_v34  ;;  %v481_v41 = vmul.f32 %v1157_v7, %v469_v35 }
 0x19d   : > { %v733_v42 = vpop.eup %732  ;;  %458 = vst [vmem:[%s1186_s11 + $0x20] sm:$0xff] %v450_v36  ;;  %498 = vst [vmem:[%s1186_s11 + $0x28] sm:$0xff] %v490_v37  ;;  %v440_v52 = vmul.f32 %v1152_v5, %v428_v38  ;;  %v480_v6 = vmul.f32 %v1157_v7, %v468_v39 }
 0x19e   : > { %v735_v53 = vpop.eup %734  ;;  %v453_v8 = vadd.f32 %v1165_v13, %v441_v40  ;;  %v493_v43 = vadd.f32 %v1170_v17, %v481_v41  ;;  %v431_v46 = vmul.f32 %v733_v42, %v1100_v60  ;;  %v471_v47 = vmul.f32 %v733_v42, %v1136_v10 }
 0x19f   : > { %v452_v48 = vadd.f32 %v1165_v13, %v440_v52  ;;  %v492_v49 = vadd.f32 %v1170_v17, %v480_v6  ;;  %v430_v50 = vmul.f32 %v735_v53, %v1103_v61  ;;  %v470_v51 = vmul.f32 %v735_v53, %v1141_v12 }
 0x1a0   : > { %461 = vst [vmem:[%s1186_s11 + $0x50] sm:$0xff] %v453_v8  ;;  %501 = vst [vmem:[%s1186_s11 + $0x58] sm:$0xff] %v493_v43  ;;  %v443_v60 = vmul.f32 %v1152_v5, %v431_v46  ;;  %v483_v10 = vmul.f32 %v1157_v7, %v471_v47 }
 0x1a1   : > { %460 = vst [vmem:[%s1186_s11 + $0x40] sm:$0xff] %v452_v48  ;;  %500 = vst [vmem:[%s1186_s11 + $0x48] sm:$0xff] %v492_v49  ;;  %v442_v61 = vmul.f32 %v1152_v5, %v430_v50  ;;  %v482_v12 = vmul.f32 %v1157_v7, %v470_v51 }
 0x1a2   : > { %v455_v54 = vadd.f32 %v1165_v13, %v443_v60  ;;  %v495_v55 = vadd.f32 %v1170_v17, %v483_v10 }
 0x1a3   : > { %v454_v56 = vadd.f32 %v1165_v13, %v442_v61  ;;  %v494_v57 = vadd.f32 %v1170_v17, %v482_v12 }
 0x1a4   : > { %463 = vst [vmem:[%s1186_s11 + $0x70] sm:$0xff] %v455_v54  ;;  %503 = vst [vmem:[%s1186_s11 + $0x78] sm:$0xff] %v495_v55 }
 0x1a5   : > { %462 = vst [vmem:[%s1186_s11 + $0x60] sm:$0xff] %v454_v56  ;;  %502 = vst [vmem:[%s1186_s11 + $0x68] sm:$0xff] %v494_v57 }
 0x1a6   : > { %803 = shalt.err (!%p800_p5)
}
 0x1a7   : > { %s804_s7 = scalar_lea.hbm %s1235_s1, 2048  ;;  %s808_s10 = scalar_lea.hbm %s1295_s4, 4096 }
 0x1a8   : > { %p805_p7 = scmp.ne.s32.totalorder %s1235_s1, %s804_s7  ;;  %p809_p9 = scmp.lt.s32.totalorder %s1235_s1, %s1295_s4 }
 0x1a9   : > { %p810_p11 = scmp.lt.s32.totalorder %s808_s10, %s804_s7 }
 0x1aa   : > { %p806_p4 = pnand %p805_p7, %p998_p13 }
 0x1ab   : > { %p811_p12 = por %p810_p11, %p809_p9 }
 0x1ac   : > { %p807_p6 = pneg %p806_p4 }
 0x1ae   : > { %p812_p1 = pnand %p811_p12, %p807_p6 }
 0x1b0   : > { %815 = shalt.err (!%p812_p1)
}
 0x1b1   : > { %s881_s11 = smov 256   ;;  %s882_s29 = smov 16  }
 0x1b2   : > { %649 = dma.vmem_to_hbm [thread:$0]  (%p998_p13), %s1237_s12, 2048, %s1235_s1, %s505_s30, %s881_s11, %s881_s11, %s882_s29  }
 0x1b3 PF: > { %s536_s18 = sand.u32 1, %s854_s15   ;;  %p1313_p8 = scmp.ne.s32.totalorder %s1303_s26, 0 }
 0x1b4   : > { %p1314_p10 = scmp.ge.s32.totalorder %s874_s20, 2  ;;  %s537_s22 = scalar_lea.sflag [#allocation4], %s536_s18 }
 0x1b6   : > { %p660_p0 = pnand %p1314_p10, %p1313_p8 }
 0x1b8   : > { %p661_p2 = pneg %p660_p0 }
 0x1ba   : > { %849 = dma.done.wait (%p661_p2), %s537_s22, 2048  }
 0x1bb   : > { %851 = vsyncadd (%p661_p2), %s537_s22, 4294965248  ;;  %s21_s20 = sadd.s32 1, %s874_s20   ;;  %s1315_s15 = smov %s858_s16 }
 0x1bc   : > { %p18_p3 = scmp.ge.s32.totalorder %s21_s20, 4   ;;  %s1316_s16 = smov %s862_s17 }
 0x1bd   : > { %s1317_s17 = smov %s1007_s28  ;;  %s1318_s18 = smov %s870_s19 }
 0x1be   : > { %s1319_s19 = smov %s1321_s5  ;;  %20 = sbr.rel (!%p18_p3) target bundleno = 9 (0x9), region = 86 }
 0x1c3   :  { %542 = vsyncpa [#allocation3], 1 }
 0x1c4   :  { %544 = vsyncpa [#allocation3 + $0x1], 1 }
 0x1c5   :  { %545 = vsyncpa [#allocation6], 1 }
 0x1c6   :  { %546 = vsyncpa [#allocation4], 1 }
 0x1c7   :  { %548 = vsyncpa [#allocation4 + $0x1], 1 }

</bundles_post_ra>
